<compile_context>
chip_gen: v6e
topology: v6e:2x2x1
jax: 0.10.0
libtpu: 0.0.40
codegen_flags: <defaults>
</compile_context>

<pallas_src>
import functools

import numpy as np
import jax
import jax.numpy as jnp
from jax.experimental import pallas as pl
from jax.experimental.pallas import tpu as pltpu

T1KNOW_SET = [42, 64, 34, 54, 55, 33, 24, 66, 47, 45, 43, 23, 3, 20, 74, 15,
              41, 25, 16, 53]


# ----------------------------------------------------------------------------
# Host-side glue: exact replica of InstanceLoss.mask_correlated_samples, kept
# as the full (N, N) 0/1 matrix (diagonal is never set).  The kernel drops the
# diagonal itself via the encoded mask, which is mathematically identical to
# the torch "pos_mask[~eye].view(N, N-1)" trick.
# ----------------------------------------------------------------------------
def build_positive_mask(batch_size, labels):
    N = 2 * batch_size
    pos_mask = np.zeros((N, N), dtype=np.int8)
    for i in range(batch_size):
        pos_mask[i, batch_size + i] = 1
        pos_mask[batch_size + i, i] = 1
    known_index = []
    for index, label in enumerate(labels):
        if int(label) in T1KNOW_SET:
            known_index.append(index)
    for i in known_index:
        # Faithfully reproduces the original (list sliced at POSITION i+1,
        # where i is a batch index) semantics.
        indices = [j for j in known_index[i + 1:] if labels[i] == labels[j]]
        for index in indices:
            pos_mask[i, index] = 1
            pos_mask[i, batch_size + i] = 1
            pos_mask[i, batch_size + index] = 1
            pos_mask[batch_size + i, batch_size + index] = 1
            pos_mask[batch_size + i, i] = 1
            pos_mask[batch_size + i, index] = 1
    return pos_mask


def encode_mask(pos01):
    """0 = negative pair, 1 = positive pair, 2 = diagonal (excluded)."""
    enc = pos01.astype(np.int8).copy()
    np.fill_diagonal(enc, 2)
    return enc


# ----------------------------------------------------------------------------
# Tiling helpers.
# ----------------------------------------------------------------------------
# Multiples of 32 so the sublane block dim is aligned for f32 (8), bf16 (16)
# and int8 (32) packed tilings alike.
_TM_LADDER = (512, 256, 128, 64, 32)


def _vmem_estimate(tm, n, d):
    """Generous per-kernel VMEM estimate (bytes) for a (tm, n) row slab."""
    resident = 2 * n * d * 2          # (D, N) bf16 resident operand (buffered)
    row_tiles = 2 * tm * d * 2        # (TM, D) bf16, double-buffered
    mask_tiles = 2 * tm * n * 1       # (TM, N) int8, double-buffered
    temps = 5 * tm * n * 4            # live f32 temporaries (sim / exp / selects)
    return resident + row_tiles + mask_tiles + temps + (1 << 20)


def _row_tile(n, d, vmem_budget=48 << 20):
    """Largest row tile (multiple of 32) giving >= 2 grid steps within budget."""
    for tm in _TM_LADDER:
        if tm < n and _vmem_estimate(tm, n, d) <= vmem_budget:
            return tm
    return _TM_LADDER[-1]


# ----------------------------------------------------------------------------
# Pallas kernel: one grid step handles a (TM, N) row slab of the similarity
# matrix and accumulates the masked loss SUM into a resident (1, 1) output.
# ----------------------------------------------------------------------------
def _instance_loss_sum_kernel(z_row_ref, z_allt_ref, mask_ref, out_ref, *,
                              inv_temp):
    i = pl.program_id(0)

    @pl.when(i == 0)
    def _init():
        out_ref[...] = jnp.zeros_like(out_ref)

    # int8 on the wire (4x less HBM->VMEM traffic); widened once in-register so
    # the derived masks share the 32-bit layout of the f32 operands.
    m = mask_ref[...].astype(jnp.int32)           # (TM, N): 0 neg, 1 pos, 2 excl
    pos_b = m == 1
    neg_b = m == 0
    valid_b = m != 2                              # off-diagonal & not padding

    # (TM, D) @ (D, N): MXU-native bf16 matmul with f32 accumulation.
    sim = jnp.dot(z_row_ref[...], z_allt_ref[...],
                  preferred_element_type=jnp.float32) * inv_temp

    neg_inf = jnp.float32(-jnp.inf)

    # Exact log-sum-exp stabilization: row max over valid (off-diagonal)
    # entries.  Every retained exp argument is <= 0, so exp is in [0, 1] and
    # can never overflow f32, even for unnormalized embeddings.
    row_max = jnp.max(jnp.where(valid_b, sim, neg_inf), axis=1, keepdims=True)
    shifted = sim - row_max
    exp_s = jnp.exp(jnp.where(valid_b, shifted, neg_inf))         # (TM, N)

    # Denominator: sum of exp over NEGATIVE pairs only (reference `fenmu`).
    fenmu = jnp.sum(jnp.where(neg_b, exp_s, 0.0), axis=1, keepdims=True)

    # -log(exp / (fenmu + exp)) == log(fenmu + exp_s) - shifted
    # (the row_max shift cancels exactly).  Only positive pairs are summed;
    # jnp.where (not multiply-by-mask) so stray inf in unselected lanes can
    # never poison the reduction.
    loss_sel = jnp.where(pos_b, jnp.log(fenmu + exp_s) - shifted, 0.0)

    tile_sum = jnp.sum(jnp.sum(loss_sel, axis=1, keepdims=True),
                       axis=0, keepdims=True)                     # (1, 1)
    out_ref[...] += tile_sum


# ----------------------------------------------------------------------------
# Wrappers
# ----------------------------------------------------------------------------
def instance_loss_from_mask(z_i, z_j, pos_mask_enc_i8, count, temperature):
    """Hot path: encoded int8 mask (0/1/2) and positive count are prebuilt."""
    z = jnp.concatenate([z_i, z_j], axis=0).astype(jnp.bfloat16)   # (N, D) bf16
    n, d = z.shape
    tm = _row_tile(n, d)
    n_tiles = pl.cdiv(n, tm)
    n_pad = n_tiles * tm

    z_t = z.T                                                      # (D, N) resident
    if n_pad != n:
        # Ragged tail: padded rows are all-"excluded" -> contribute exactly 0.
        z_rows = jnp.concatenate(
            [z, jnp.zeros((n_pad - n, d), z.dtype)], axis=0)
        mask_rows = jnp.concatenate(
            [pos_mask_enc_i8, jnp.full((n_pad - n, n), 2, jnp.int8)], axis=0)
    else:
        z_rows, mask_rows = z, pos_mask_enc_i8

    kernel = functools.partial(_instance_loss_sum_kernel,
                               inv_temp=1.0 / float(temperature))
    vmem_limit = int(min(max(2 * _vmem_estimate(tm, n, d), 32 << 20), 64 << 20))

    total = pl.pallas_call(
        kernel,
        out_shape=jax.ShapeDtypeStruct((1, 1), jnp.float32),
        grid=(n_tiles,),
        in_specs=[
            pl.BlockSpec((tm, d), lambda i: (i, 0)),    # row tile of z (bf16)
            pl.BlockSpec((d, n), lambda i: (0, 0)),     # z^T, resident (bf16)
            pl.BlockSpec((tm, n), lambda i: (i, 0)),    # int8 mask tile, streamed
        ],
        out_specs=pl.BlockSpec((1, 1), lambda i: (0, 0)),  # resident accumulator
        compiler_params=pltpu.CompilerParams(
            dimension_semantics=("arbitrary",),   # accumulating output
            vmem_limit_bytes=vmem_limit),
        cost_estimate=pl.CostEstimate(
            flops=2 * n * n * d + 10 * n * n,
            transcendentals=2 * n * n,
            bytes_accessed=n_pad * n + 2 * n * d * 2 + 4),
    )(z_rows, z_t, mask_rows)

    # count is data-independent of z -> computed on host, divided here.
    return total[0, 0] / count


def instance_loss(z_i, z_j, labels, batch_size, temperature):
    """Convenience wrapper: builds the positive mask host-side (as in the
    PyTorch forward) then runs the Pallas kernel."""
    pos01 = build_positive_mask(batch_size, np.asarray(labels))   # (N, N) 0/1
    count = float(pos01.sum())                                    # host scalar
    enc = jnp.asarray(encode_mask(pos01))                         # int8, diag=2
    return instance_loss_from_mask(z_i, z_j, enc, count, temperature)


# ----------------------------------------------------------------------------
# Pure numpy (float64) replica of the PyTorch forward, for verification.
# ----------------------------------------------------------------------------
def _reference_loss_from_z(z_np, pos01, temperature):
    z = np.asarray(z_np, dtype=np.float64)
    n = z.shape[0]
    sim = (z @ z.T) / temperature
    od = ~np.eye(n, dtype=bool)
    logits = sim[od].reshape(n, n - 1)
    mask_od = pos01[od].reshape(n, n - 1).astype(np.float64)
    exp_logits = np.exp(logits)
    fenmu = np.sum(exp_logits * (1 - mask_od), axis=1, keepdims=True)
    loss = -np.log(exp_logits / (fenmu + exp_logits))
    return loss[mask_od.astype(bool)].mean()


if __name__ == "__main__":
    batch_size = 32
    hidden = 32
    temperature = 0.5

    key = jax.random.PRNGKey(0)
    k1, k2, k3 = jax.random.split(key, 3)
    z_i = jax.random.normal(k1, (batch_size, hidden), dtype=jnp.float32)
    z_j = jax.random.normal(k2, (batch_size, hidden), dtype=jnp.float32)
    labels = np.asarray(
        jax.random.randint(k3, (batch_size,), 0, 80, dtype=jnp.int32))

    loss = instance_loss(z_i, z_j, labels, batch_size, temperature)
    loss = jax.block_until_ready(loss)

    # f64 reference on the SAME bf16-rounded embeddings the kernel consumes,
    # so the check isolates kernel math from the deliberate bf16 input cast.
    pos01 = build_positive_mask(batch_size, labels)
    z_bf16 = np.asarray(
        jnp.concatenate([z_i, z_j], axis=0).astype(jnp.bfloat16)
    ).astype(np.float64)
    ref = _reference_loss_from_z(z_bf16, pos01, temperature)

    assert np.isfinite(float(loss)), f"non-finite loss: {loss}"
    np.testing.assert_allclose(float(loss), float(ref), rtol=2e-4, atol=2e-4)

    print("KERNEL_OK")
</pallas_src>

<mosaic_0001>
module attributes {stable_mosaic.version = 11 : i64} {
  func.func @_instance_loss_sum_kernel(%arg0: i32, %arg1: memref<32x32xbf16, #tpu.memory_space<vmem>>, %arg2: memref<32x64xbf16, #tpu.memory_space<vmem>>, %arg3: memref<32x64xi8, #tpu.memory_space<vmem>>, %arg4: memref<1x1xf32, #tpu.memory_space<vmem>>) attributes {dimension_semantics = [#tpu.dimension_semantics<arbitrary>], iteration_bounds = array<i64: 2>, scalar_prefetch = 0 : i64, scratch_operands = 0 : i64, tpu.core_type = #tpu.core_type<tc>, window_params = [{transform_indices = @transform_0, window_bounds = array<i64: 32, 32>}, {pipeline_mode = #tpu.pipeline_mode<synchronous>, transform_indices = @transform_1, window_bounds = array<i64: 32, 64>}, {transform_indices = @transform_2, window_bounds = array<i64: 32, 64>}, {pipeline_mode = #tpu.pipeline_mode<synchronous>, transform_indices = @transform_3, window_bounds = array<i64: 1, 1>}]} {
    %c0_i32 = arith.constant 0 : i32
    %0 = arith.cmpi eq, %arg0, %c0_i32 : i32
    %1 = arith.extui %0 : i1 to i32
    %c0_i32_0 = arith.constant 0 : i32
    %2 = arith.cmpi ne, %1, %c0_i32_0 : i32
    scf.if %2 {
      %cst_20 = arith.constant 0.000000e+00 : f32
      %42 = vector.broadcast %cst_20 : f32 to vector<1x1xf32>
      %c0_21 = arith.constant 0 : index
      %c0_22 = arith.constant 0 : index
      %43 = vector.load %arg4[%c0_21, %c0_22] : memref<1x1xf32, #tpu.memory_space<vmem>>, vector<1x1xf32>
      tpu.vector_store %arg4[%c0_21, %c0_22], %42 {strides = array<i32>} : memref<1x1xf32, #tpu.memory_space<vmem>>, vector<1x1xf32>,
    } else {
    }
    %c0 = arith.constant 0 : index
    %c0_1 = arith.constant 0 : index
    %3 = vector.load %arg3[%c0, %c0_1] : memref<32x64xi8, #tpu.memory_space<vmem>>, vector<32x64xi8>
    %4 = arith.extsi %3 : vector<32x64xi8> to vector<32x64xi32>
    %c1_i32 = arith.constant 1 : i32
    %5 = vector.broadcast %c1_i32 : i32 to vector<32x64xi32>
    %6 = arith.cmpi eq, %4, %5 : vector<32x64xi32>
    %c0_i32_2 = arith.constant 0 : i32
    %7 = vector.broadcast %c0_i32_2 : i32 to vector<32x64xi32>
    %8 = arith.cmpi eq, %4, %7 : vector<32x64xi32>
    %c2_i32 = arith.constant 2 : i32
    %9 = vector.broadcast %c2_i32 : i32 to vector<32x64xi32>
    %10 = arith.cmpi ne, %4, %9 : vector<32x64xi32>
    %c0_3 = arith.constant 0 : index
    %c0_4 = arith.constant 0 : index
    %11 = vector.load %arg1[%c0_3, %c0_4] : memref<32x32xbf16, #tpu.memory_space<vmem>>, vector<32x32xbf16>
    %c0_5 = arith.constant 0 : index
    %c0_6 = arith.constant 0 : index
    %12 = vector.load %arg2[%c0_5, %c0_6] : memref<32x64xbf16, #tpu.memory_space<vmem>>, vector<32x64xbf16>
    %cst = arith.constant dense<0.000000e+00> : vector<32x64xf32>
    %13 = tpu.matmul %11, %12, %cst {dimension_numbers = #tpu.dot_dimension_numbers<[1], [0], [0], [1], [0, 0, 1, 1], [], []>} : vector<32x32xbf16>, vector<32x64xbf16>, vector<32x64xf32> -> vector<32x64xf32>
    %cst_7 = arith.constant 2.000000e+00 : f32
    %14 = vector.broadcast %cst_7 : f32 to vector<32x64xf32>
    %15 = arith.mulf %13, %14 : vector<32x64xf32>
    %cst_8 = arith.constant 0xFF800000 : f32
    %16 = vector.broadcast %cst_8 : f32 to vector<32x64xf32>
    %17 = arith.select %10, %15, %16 : vector<32x64xi1>, vector<32x64xf32>
    %cst_9 = arith.constant dense<0xFF800000> : vector<32xf32>
    %18 = vector.multi_reduction <maximumf>, %17, %cst_9 [1] : vector<32x64xf32> to vector<32xf32>
    %19 = vector.shape_cast %18 : vector<32xf32> to vector<32x1xf32>
    %20 = vector.broadcast %19 : vector<32x1xf32> to vector<32x64xf32>
    %21 = arith.subf %15, %20 : vector<32x64xf32>
    %cst_10 = arith.constant 0xFF800000 : f32
    %22 = vector.broadcast %cst_10 : f32 to vector<32x64xf32>
    %23 = arith.select %10, %21, %22 : vector<32x64xi1>, vector<32x64xf32>
    %24 = math.exp %23 : vector<32x64xf32>
    %cst_11 = arith.constant 0.000000e+00 : f32
    %25 = vector.broadcast %cst_11 : f32 to vector<32x64xf32>
    %26 = arith.select %8, %24, %25 : vector<32x64xi1>, vector<32x64xf32>
    %cst_12 = arith.constant dense<0.000000e+00> : vector<32xf32>
    %27 = vector.multi_reduction <add>, %26, %cst_12 [1] : vector<32x64xf32> to vector<32xf32>
    %28 = vector.shape_cast %27 : vector<32xf32> to vector<32x1xf32>
    %29 = vector.broadcast %28 : vector<32x1xf32> to vector<32x64xf32>
    %30 = arith.addf %29, %24 : vector<32x64xf32>
    %31 = math.log %30 : vector<32x64xf32>
    %32 = arith.subf %31, %21 : vector<32x64xf32>
    %cst_13 = arith.constant 0.000000e+00 : f32
    %33 = vector.broadcast %cst_13 : f32 to vector<32x64xf32>
    %34 = arith.select %6, %32, %33 : vector<32x64xi1>, vector<32x64xf32>
    %cst_14 = arith.constant dense<0.000000e+00> : vector<32xf32>
    %35 = vector.multi_reduction <add>, %34, %cst_14 [1] : vector<32x64xf32> to vector<32xf32>
    %36 = vector.shape_cast %35 : vector<32xf32> to vector<32x1xf32>
    %cst_15 = arith.constant dense<0.000000e+00> : vector<1xf32>
    %37 = vector.multi_reduction <add>, %36, %cst_15 [0] : vector<32x1xf32> to vector<1xf32>
    %38 = vector.shape_cast %37 : vector<1xf32> to vector<1x1xf32>
    %c0_16 = arith.constant 0 : index
    %c0_17 = arith.constant 0 : index
    %39 = vector.load %arg4[%c0_16, %c0_17] : memref<1x1xf32, #tpu.memory_space<vmem>>, vector<1x1xf32>
    %40 = arith.addf %39, %38 : vector<1x1xf32>
    %c0_18 = arith.constant 0 : index
    %c0_19 = arith.constant 0 : index
    %41 = vector.load %arg4[%c0_18, %c0_19] : memref<1x1xf32, #tpu.memory_space<vmem>>, vector<1x1xf32>
    tpu.vector_store %arg4[%c0_18, %c0_19], %40 {strides = array<i32>} : memref<1x1xf32, #tpu.memory_space<vmem>>, vector<1x1xf32>,
    return
  }
  func.func @transform_0(%arg0: i32) -> (i32, i32) {
    %c0_i32 = arith.constant 0 : i32
    %c0_i32_0 = arith.constant 0 : i32
    return %arg0, %c0_i32 : i32, i32
  }
  func.func @transform_1(%arg0: i32) -> (i32, i32) {
    %c0_i32 = arith.constant 0 : i32
    %c0_i32_0 = arith.constant 0 : i32
    %c0_i32_1 = arith.constant 0 : i32
    return %c0_i32, %c0_i32_0 : i32, i32
  }
  func.func @transform_2(%arg0: i32) -> (i32, i32) {
    %c0_i32 = arith.constant 0 : i32
    %c0_i32_0 = arith.constant 0 : i32
    return %arg0, %c0_i32 : i32, i32
  }
  func.func @transform_3(%arg0: i32) -> (i32, i32) {
    %c0_i32 = arith.constant 0 : i32
    %c0_i32_0 = arith.constant 0 : i32
    %c0_i32_1 = arith.constant 0 : i32
    return %c0_i32, %c0_i32_0 : i32, i32
  }
}

</mosaic_0001>

<bundles_post_ra>
// kernel: tpu_custom_call.1
= control target key start
LH: loop header
LB: loop body
LE: loop exit
PB: predicated region body
PF: predicated region fallthrough
CT: control target
= control target key end

     0   :  { %8 = vsyncpa [#allocation3], 0  ;;  %s566_s12 = smov 0   ;;  %s663_s0 = inlined_call_operand.vmem [shape: bf16[64,32], index: 0, kind: input, shape index: {}]   ;;  %s664_s1 = inlined_call_operand.vmem [shape: bf16[32,64], index: 1, kind: input, shape index: {}]   ;;  %s665_s2 = inlined_call_operand.vmem [shape: s8[64,64], index: 2, kind: input, shape index: {}]   ;;  %s666_s3 = inlined_call_operand.hbm [shape: f32[1,1], index: 3, kind: output, shape index: {}]  }
   0x1 LB: > { %s572_s13 = sadd.s32 4294967295, %s542_s12   ;;  %p445_p0 = scmp.ge.s32.totalorder %s542_s12, 1  ;;  %s542_s12 = sphi %s566_s12, %s14_s12  }
   0x2   : > { %p143_p1 = scmp.lt.s32.totalorder %s542_s12, 3 }
   0x4   : > { %p144_p2 = pnand %p445_p0, %p143_p1 }
   0x5   : > { %s446_s14 = sshll.u32 (!%p144_p2), %s572_s13, 2  ;;  %p172_p3 = scmp.lt.s32.totalorder (!%p144_p2), %s572_s13, 1 }
   0x6   : > { %147 = sbr.rel (%p144_p2) target bundleno = 713 (0x2c9), region = 32  ;;  %p167_p4 = scmp.lt.s32.totalorder (!%p144_p2), %s446_s14, 7 }
   0x7   : > { %p449_p5 = scmp.ne.s32.totalorder (!%p144_p2), %s572_s13, 0 }
   0xb   : > { %s173_s15 = scalar_select %p172_p3, %s572_s13, 1 }
   0xc   : > { %s668_s14 = smov (!%p167_p4, %s446_s14), 7  ;;  %180 = sbr.rel (%p449_p5) target bundleno = 19 (0x13), region = 36 }
   0xd   : > { %s448_s16 = sshll.u32 %s173_s15, 3  ;;  %s447_s17 = sshll.u32 %s668_s14, 2 }
   0xe   : > { %s175_s20 = scalar_lea.vmem %s665_s2, %s448_s16  ;;  %s170_s23 = scalar_lea.vmem %s663_s0, %s447_s17 }
  0x11   : > { %vm181_vm0 = vcmask 0   ;;  %v544_v0 = vmov 0.0  }
  0x12   : > { %182 = vst.msk [vmem:[#allocation2] sm:$0x1] %vm181_vm0, %v544_v0 }
  0x13 PF: > { %v488_v1 = vld [vmem:[%s664_s1 + $0x8] sm:$0xff]   ;;  %vm230_vm1 = vcmask 261120   ;;  %v489_v2 = vld [vmem:[%s664_s1] sm:$0xff]   ;;  %vm294_vm3 = vcmask 523264   ;;  %s545_s28 = smov [#allocation2]   ;;  %vm382_vm15 = vcmask 0  }
  0x14   : > { %464 = vmatprep.subr.bf16.mxu0 %v488_v1  ;;  %v490_v3 = vld [vmem:[%s170_s23] sm:$0xff]   ;;  %v491_v4 = vld [vmem:[%s170_s23 + $0x8] sm:$0xff]   ;;  %s391_s29 = sshll.u32 %s545_s28, 4  ;;  %p476_p6 = scmp.eq.s32.totalorder %s572_s13, 1  ;;  %s392_s29 = int_to_ptr.vmem [resolvable:$true] %s391_s29 }
  0x15   : > { %465 = vmatpush3.bf16.msra.mxu0 %v488_v1  ;;  %468 = vmatprep.mubr.msk.bf16.mxu0 %vm230_vm1, %v490_v3  ;;  %v183_v5 = vld [vmem:[%s175_s20] sm:$0xff]  ;;  %s508_s30 = scalar_lea.vmem %s392_s29, 16  ;;  %s514_s4 = scalar_lea.vmem %s392_s29, 32 }
  0x16   : > { %466 = vmatprep.subr.bf16.mxu0 %v489_v2  ;;  %v592_v6 = vunpack.c.2.s8 %v183_v5  ;;  %v594_v7 = vunpack.c.0.s8 %v183_v5  ;;  %v597_v9 = vunpack.c.3.s8 %v183_v5  ;;  %v600_v12 = vunpack.c.1.s8 %v183_v5  ;;  %p509_p7 = scmp.ne.s32.totalorder %s392_s29, %s508_s30  ;;  %p515_p10 = scmp.lt.s32.totalorder %s392_s29, %s392_s29 }
  0x17   : > { %p516_p11 = scmp.lt.s32.totalorder %s514_s4, %s508_s30 }
  0x18   : > { %vm198_vm2 = vcmp.ne.s32.totalorder %v592_v6, 2  ;;  %vm196_vm4 = vcmp.ne.s32.totalorder %v594_v7, 2  ;;  %vm199_vm5 = vcmp.ne.s32.totalorder %v597_v9, 2  ;;  %vm197_vm6 = vcmp.ne.s32.totalorder %v600_v12, 2  ;;  %p510_p8 = pnand %p509_p7, %p476_p6 }
  0x19   : > { %467 = vmatpush3.bf16.msra.mxu0 %v489_v2  ;;  %vm192_vm7 = vcmp.eq.s32.totalorder %v594_v7, 0  ;;  %vm194_vm8 = vcmp.eq.s32.totalorder %v592_v6, 0  ;;  %vm193_vm9 = vcmp.eq.s32.totalorder %v600_v12, 0  ;;  %vm195_vm10 = vcmp.eq.s32.totalorder %v597_v9, 0  ;;  %p517_p12 = por %p516_p11, %p515_p10 }
  0x1a   : > { %vm188_vm11 = vcmp.eq.s32.totalorder %v594_v7, 1  ;;  %vm189_vm12 = vcmp.eq.s32.totalorder %v600_v12, 1  ;;  %vm190_vm13 = vcmp.eq.s32.totalorder %v592_v6, 1  ;;  %vm191_vm14 = vcmp.eq.s32.totalorder %v597_v9, 1  ;;  %p511_p9 = pneg %p510_p8 }
  0x1c   : > { %469 = vmatmul.mubr.msk.bf16.vlgmr.msra.gmra.mxu0 %vm230_vm1, %v491_v4  ;;  %p518_p13 = pnand %p517_p12, %p511_p9 }
  0xdc   : > { %v470_v8 = vpop.f32.mrf.mxu0 }
  0xdd   : > { %v288_v10 = vmul.f32 2.0, %v470_v8 }
  0xde   : > { %v271_v11 = vpop.f32.mrf.mxu0 }
  0xdf   : > { %v286_v13 = vmul.f32 2.0, %v271_v11  ;;  %v292_v14 = vsel %vm198_vm2, %v288_v10, -inf }
  0xe0   : > { %v471_v15 = vpop.f32.mrf.mxu0  ;;  %v301_v16 = vsel %vm294_vm3, %v292_v14, -inf }
  0xe1   : > { %v289_v17 = vmul.f32 2.0, %v471_v15  ;;  %302 = vmax.xlane.f32.xlu1 %v301_v16  ;;  %v290_v18 = vsel %vm196_vm4, %v286_v13, -inf }
  0xe2   : > { %v274_v19 = vpop.f32.mrf.mxu0  ;;  %v295_v20 = vsel %vm294_vm3, %v290_v18, -inf }
  0xe3   : > { %v287_v21 = vmul.f32 2.0, %v274_v19  ;;  %296 = vmax.xlane.f32.xlu0 %v295_v20  ;;  %v293_v22 = vsel %vm199_vm5, %v289_v17, -inf }
  0xe4   : > { %v304_v23 = vsel %vm294_vm3, %v293_v22, -inf }
  0xe5   : > { %305 = vmax.xlane.f32.xlu1 %v304_v23  ;;  %v291_v24 = vsel %vm197_vm6, %v287_v21, -inf }
  0xe6   : > { %v298_v25 = vsel %vm294_vm3, %v291_v24, -inf }
  0xe7   : > { %299 = vmax.xlane.f32.xlu0 %v298_v25 }
 0x16a   : > { %v303_v26 = vpop.xlane.xlu1 %302 }
 0x16b   : > { %v616_v27 = vsub.f32 %v288_v10, %v303_v26 }
 0x16c   : > { %v297_v28 = vpop.xlane.xlu0 %296 }
 0x16d   : > { %v313_v29 = vsel %vm198_vm2, %v616_v27, -inf  ;;  %v307_v30 = vsub.f32 %v286_v13, %v297_v28 }
 0x16e   : > { %v319_v31 = vmul.f32 1.442695, %v313_v29  ;;  %v306_v32 = vpop.xlane.xlu1 %305 }
 0x16f   : > { %v311_v33 = vsel %vm196_vm4, %v307_v30, -inf  ;;  %v623_v34 = vsub.f32 %v289_v17, %v306_v32 }
 0x170   : > { %v315_v35 = vmul.f32 1.442695, %v311_v33  ;;  %v300_v36 = vpop.xlane.xlu0 %299  ;;  %492 = vpow2.f32 %v319_v31 }
 0x171   : > { %v314_v37 = vsel %vm199_vm5, %v623_v34, -inf  ;;  %v308_v38 = vsub.f32 %v287_v21, %v300_v36 }
 0x172   : > { %494 = vpow2.f32 %v315_v35  ;;  %v321_v39 = vmul.f32 1.442695, %v314_v37 }
 0x173   : > { %v312_v40 = vsel %vm197_vm6, %v308_v38, -inf }
 0x174   : > { %v317_v41 = vmul.f32 1.442695, %v312_v40  ;;  %496 = vpow2.f32 %v321_v39 }
 0x176   : > { %498 = vpow2.f32 %v317_v41 }
 0x17d   : > { %v493_v42 = vpop.eup %492 }
 0x17e   : > { %v325_v47 = vsel %vm194_vm8, %v493_v42, 0.0 }
 0x17f   : > { %v495_v43 = vpop.eup %494  ;;  %v333_v51 = vsel %vm294_vm3, %v325_v47, 0.0 }
 0x180   : > { %v323_v44 = vsel %vm192_vm7, %v495_v43, 0.0 }
 0x181   : > { %v327_v45 = vsel %vm294_vm3, %v323_v44, 0.0  ;;  %v497_v46 = vpop.eup %496 }
 0x182   : > { %328 = vadd.xlane.f32.xlu0 %v327_v45  ;;  %v326_v52 = vsel %vm195_vm10, %v497_v46, 0.0 }
 0x183   : > { %v499_v48 = vpop.eup %498  ;;  %v336_v53 = vsel %vm294_vm3, %v326_v52, 0.0 }
 0x184   : > { %v324_v49 = vsel %vm193_vm9, %v499_v48, 0.0 }
 0x185   : > { %v330_v50 = vsel %vm294_vm3, %v324_v49, 0.0 }
 0x186   : > { %331 = vadd.xlane.f32.xlu1 %v330_v50  ;;  %334 = vadd.xlane.f32.xlu0 %v333_v51 }
 0x18a   : > { %337 = vadd.xlane.f32.xlu1 %v336_v53 }
 0x20b   : > { %v329_v54 = vpop.xlane.xlu0 %328 }
 0x20c   : > { %v339_v55 = vadd.f32 %v495_v43, %v329_v54 }
 0x20e   : > { %500 = vlog2.f32 %v339_v55 }
 0x20f   : > { %v332_v56 = vpop.xlane.xlu1 %331  ;;  %v335_v57 = vpop.xlane.xlu0 %334 }
 0x210   : > { %v340_v58 = vadd.f32 %v499_v48, %v332_v56  ;;  %v341_v59 = vadd.f32 %v493_v42, %v335_v57 }
 0x212   : > { %502 = vlog2.f32 %v340_v58 }
 0x213   : > { %504 = vlog2.f32 %v341_v59  ;;  %v338_v60 = vpop.xlane.xlu1 %337 }
 0x214   : > { %v342_v61 = vadd.f32 %v497_v46, %v338_v60 }
 0x216   : > { %506 = vlog2.f32 %v342_v61 }
 0x21b   : > { %v501_v62 = vpop.eup %500 }
 0x21c   : > { %v344_v63 = vmul.f32 0.6931472, %v501_v62 }
 0x21e   : > { %v351_v0 = vsub.f32 %v344_v63, %v307_v30  ;;  %v380_v30 = vld [vmem:[#allocation2] sm:$0x1] }
 0x21f   : > { %v503_v1 = vpop.eup %502 }
 0x220   : > { %v505_v2 = vpop.eup %504  ;;  %v346_v3 = vmul.f32 0.6931472, %v503_v1  ;;  %v355_v4 = vsel %vm188_vm11, %v351_v0, 0.0 }
 0x221   : > { %v348_v5 = vmul.f32 0.6931472, %v505_v2  ;;  %v359_v8 = vsel %vm294_vm3, %v355_v4, 0.0 }
 0x222   : > { %360 = vadd.xlane.f32.xlu0 %v359_v8  ;;  %v352_v10 = vsub.f32 %v346_v3, %v308_v38 }
 0x223   : > { %v507_v11 = vpop.eup %506  ;;  %v353_v13 = vsub.f32 %v348_v5, %v616_v27 }
 0x224   : > { %v350_v14 = vmul.f32 0.6931472, %v507_v11  ;;  %v356_v15 = vsel %vm189_vm12, %v352_v10, 0.0 }
 0x225   : > { %v362_v7 = vsel %vm294_vm3, %v356_v15, 0.0  ;;  %v357_v16 = vsel %vm190_vm13, %v353_v13, 0.0 }
 0x226   : > { %363 = vadd.xlane.f32.xlu1 %v362_v7  ;;  %v365_v17 = vsel %vm294_vm3, %v357_v16, 0.0  ;;  %v354_v18 = vsub.f32 %v350_v14, %v623_v34 }
 0x227   : > { %366 = vadd.xlane.f32.xlu0 %v365_v17 }
 0x228   : > { %v358_v12 = vsel %vm191_vm14, %v354_v18, 0.0 }
 0x229   : > { %v368_v19 = vsel %vm294_vm3, %v358_v12, 0.0 }
 0x22a   : > { %369 = vadd.xlane.f32.xlu1 %v368_v19 }
 0x2ab   : > { %v361_v6 = vpop.xlane.xlu0 %360 }
 0x2af   : > { %v364_v20 = vpop.xlane.xlu1 %363 }
 0x2b0   : > { %v371_v21 = vadd.f32 %v364_v20, %v361_v6  ;;  %v367_v22 = vpop.xlane.xlu0 %366 }
 0x2b2   : > { %v372_v23 = vadd.f32 %v371_v21, %v367_v22 }
 0x2b3   : > { %v370_v24 = vpop.xlane.xlu1 %369 }
 0x2b4   : > { %v373_v25 = vadd.f32 %v372_v23, %v370_v24 }
 0x2b6   : > { %v374_v26 = vrot.slane %v373_v25, 4 }
 0x2b8   : > { %v375_v9 = vadd.f32 %v374_v26, %v373_v25 }
 0x2ba   : > { %v376_v27 = vrot.slane %v375_v9, 2 }
 0x2bc   : > { %v377_v28 = vadd.f32 %v376_v27, %v375_v9 }
 0x2be   : > { %v378_v29 = vrot.slane %v377_v28, 1 }
 0x2c0   : > { %v379_v31 = vadd.f32 %v378_v29, %v377_v28 }
 0x2c2   : > { %v381_v32 = vadd.f32 %v380_v30, %v379_v31 }
 0x2c4   : > { %383 = vst.msk [vmem:[#allocation2] sm:$0x1] %vm382_vm15, %v381_v32 }
 0x2c5   : > { %521 = shalt.err (!%p518_p13)
}
 0x2c6   : > { %473 = dma.vmem_to_hbm [thread:$0]  (%p476_p6), %s392_s29, 16, %s666_s3, [#allocation3]  }
 0x2c7   : > { %537 = dma.done.wait (%p476_p6), [#allocation3], 16  }
 0x2c8   : > { %539 = vsyncadd (%p476_p6), [#allocation3], 4294967280 }
 0x2c9 PF: > { %s14_s12 = sadd.s32 1, %s542_s12  }
 0x2ca   : > { %p11_p0 = scmp.ge.s32.totalorder %s14_s12, 4  }
 0x2cc   :  { %13 = sbr.rel (!%p11_p0) target bundleno = 1 (0x1), region = 66 }
 0x2d1   :  { %404 = vsyncpa [#allocation3], 1 }
 0x2d2   :  { %406 = vsyncpa [#allocation3 + $0x1], 1 }

</bundles_post_ra>
